<compile_context>
chip_gen: v5e
topology: v5e:2x2
jax: 0.10.0
libtpu: 0.0.40
codegen_flags: <defaults>
</compile_context>

<pallas_src>
import functools

import jax
import jax.numpy as jnp
from jax.experimental import pallas as pl
from jax.experimental.pallas import tpu as pltpu

HIDDEN = 20      # hidden width of the MLP (2 -> 20 -> 2)
PACK_ROWS = 24   # sublane-aligned (multiple of 8) rows for the param slab


# ----------------------------------------------------------------------------
# Parameter packing: one (24, 128) f32 slab, column-major so each weight vector
# is a broadcast-ready (20, 1) column.
#   col 0: w1[0, :]   col 1: w1[1, :]   col 2: b1[:]
#   col 3: w2[:, 0]   col 4: w2[:, 1]   col 5: b2[0], b2[1] in rows 0..1
# ----------------------------------------------------------------------------
def pack_params(w1, b1, w2, b2, dtype=jnp.float32):
    p = jnp.zeros((PACK_ROWS, 128), dtype)
    p = p.at[:HIDDEN, 0].set(w1[0].astype(dtype))
    p = p.at[:HIDDEN, 1].set(w1[1].astype(dtype))
    p = p.at[:HIDDEN, 2].set(b1.astype(dtype))
    p = p.at[:HIDDEN, 3].set(w2[:, 0].astype(dtype))
    p = p.at[:HIDDEN, 4].set(w2[:, 1].astype(dtype))
    p = p.at[:2, 5].set(b2.astype(dtype))
    return p


def _unpack_broadcast(p, tb, w2_scale=1.0):
    """Broadcast packed columns to lane-dense (HIDDEN, tb) slabs (hoisted)."""
    w1c0 = jnp.broadcast_to(p[:HIDDEN, 0:1], (HIDDEN, tb))
    w1c1 = jnp.broadcast_to(p[:HIDDEN, 1:2], (HIDDEN, tb))
    b1 = jnp.broadcast_to(p[:HIDDEN, 2:3], (HIDDEN, tb))
    s = jnp.float32(w2_scale)
    w2c0 = jnp.broadcast_to(p[:HIDDEN, 3:4], (HIDDEN, tb)) * s
    w2c1 = jnp.broadcast_to(p[:HIDDEN, 4:5], (HIDDEN, tb)) * s
    b2_0 = jnp.broadcast_to(p[0:1, 5:6], (1, tb)) * s
    b2_1 = jnp.broadcast_to(p[1:2, 5:6], (1, tb)) * s
    return w1c0, w1c1, b1, w2c0, w2c1, b2_0, b2_1


def _mlp_rows(y0, y1, w1c0, w1c1, b1, w2c0, w2c1, b2_0, b2_1, tb):
    """Lane-dense MLP: y rows are (1, tb); hidden is (HIDDEN, tb).

    Layer 1 is two sublane broadcasts + VPU FMAs; layer 2 is a dense multiply
    plus a sublane (axis=0) reduction -- no cross-lane reductions, no concat,
    no MXU.
    """
    h = jnp.tanh(jnp.broadcast_to(y0, (HIDDEN, tb)) * w1c0
                 + jnp.broadcast_to(y1, (HIDDEN, tb)) * w1c1 + b1)
    o0 = jnp.sum(h * w2c0, axis=0, keepdims=True) + b2_0   # (1, tb)
    o1 = jnp.sum(h * w2c1, axis=0, keepdims=True) + b2_1   # (1, tb)
    return o0, o1


# ----------------------------------------------------------------------------
# Kernels
# ----------------------------------------------------------------------------
def odefunc_kernel(y_ref, p_ref, out_ref):
    """Single derivative evaluation on one (2, tb) batch-in-lanes tile."""
    tb = y_ref.shape[1]
    params = _unpack_broadcast(p_ref[...], tb)
    y0 = y_ref[0:1, :].astype(jnp.float32)
    y1 = y_ref[1:2, :].astype(jnp.float32)
    o0, o1 = _mlp_rows(y0, y1, *params, tb)
    out_ref[0:1, :] = o0.astype(out_ref.dtype)
    out_ref[1:2, :] = o1.astype(out_ref.dtype)


def euler_kernel(y_ref, p_ref, out_ref, *, num_steps, dt):
    """Fused explicit-Euler integration: num_steps derivative evals per call.

    Weights are broadcast once (loop-invariant, hoisted) and dt is folded into
    the second-layer weights/bias, so the step body has no per-step dt multiply.
    """
    tb = y_ref.shape[1]
    w1c0, w1c1, b1, w2c0, w2c1, b2_0, b2_1 = _unpack_broadcast(
        p_ref[...], tb, w2_scale=dt)

    def step(_, carry):
        ya, yb = carry
        d0, d1 = _mlp_rows(ya, yb, w1c0, w1c1, b1, w2c0, w2c1, b2_0, b2_1, tb)
        return ya + d0, yb + d1        # d already includes the dt factor

    # Sequentially dependent steps: full unroll only for short loops.
    if num_steps <= 16:
        unroll = True
    elif num_steps % 4 == 0:
        unroll = 4
    elif num_steps % 2 == 0:
        unroll = 2
    else:
        unroll = 1

    y0 = y_ref[0:1, :].astype(jnp.float32)
    y1 = y_ref[1:2, :].astype(jnp.float32)
    yaf, ybf = jax.lax.fori_loop(0, num_steps, step, (y0, y1), unroll=unroll)
    out_ref[0:1, :] = yaf.astype(out_ref.dtype)
    out_ref[1:2, :] = ybf.astype(out_ref.dtype)


# ----------------------------------------------------------------------------
# Wrappers
# ----------------------------------------------------------------------------
def _round_up(x, m):
    return ((x + m - 1) // m) * m


def _choose_tb(batch, max_tb=8192):
    """Lane-aligned batch tile; >=2 tiles when possible (both v7x TensorCores)."""
    bp = _round_up(max(batch, 1), 128)
    if bp <= 128:
        return 128
    half = _round_up(pl.cdiv(bp, 2), 128)
    return int(min(max_tb, half))


def _batched_pallas(kernel_fn, y, packed_params, *, max_tb=8192):
    """Grid over the (lane) batch dim; one param slab re-used across all tiles."""
    B, F = y.shape
    assert F == 2, "ODEFunc expects 2 state features"
    tb = _choose_tb(B, max_tb)
    bp = _round_up(_round_up(B, 128), tb)

    # Batch-minor layout: (2, bp), zero-padded columns are sliced off below.
    yt = jnp.zeros((F, bp), jnp.float32).at[:, :B].set(y.T.astype(jnp.float32))

    out = pl.pallas_call(
        kernel_fn,
        out_shape=jax.ShapeDtypeStruct((F, bp), jnp.float32),
        grid=(bp // tb,),
        in_specs=[
            pl.BlockSpec((F, tb), lambda i: (0, i)),            # state tile
            pl.BlockSpec((PACK_ROWS, 128), lambda i: (0, 0)),   # params (1 DMA)
        ],
        out_specs=pl.BlockSpec((F, tb), lambda i: (0, i)),
        compiler_params=pltpu.CompilerParams(
            dimension_semantics=("parallel",)),   # 2 TCs on v7x; harmless elsewhere
    )(yt, packed_params)
    return out[:, :B].T.astype(y.dtype)


def odefunc_forward(t, y, packed_params, *, max_tb=8192):
    """Equivalent of ODEFunc.forward(t, y); t is unused (as in the module)."""
    del t
    return _batched_pallas(odefunc_kernel, y, packed_params, max_tb=max_tb)


def odefunc_integrate_euler(y0, packed_params, *, num_steps, dt, max_tb=8192):
    """Fused solver demo: num_steps Euler steps of dy/dt = ODEFunc(t, y)."""
    kernel = functools.partial(euler_kernel, num_steps=int(num_steps), dt=float(dt))
    return _batched_pallas(kernel, y0, packed_params, max_tb=max_tb)


# ----------------------------------------------------------------------------
# Deterministic init mimicking nn.Linear's U(-1/sqrt(fan_in), 1/sqrt(fan_in)).
# ----------------------------------------------------------------------------
def init_params(key, dtype=jnp.float32):
    k1, k2, k3, k4 = jax.random.split(key, 4)
    lim1 = 1.0 / jnp.sqrt(2.0)
    lim2 = 1.0 / jnp.sqrt(20.0)
    w1 = jax.random.uniform(k1, (2, HIDDEN), dtype, minval=-lim1, maxval=lim1)
    b1 = jax.random.uniform(k2, (HIDDEN,), dtype, minval=-lim1, maxval=lim1)
    w2 = jax.random.uniform(k3, (HIDDEN, 2), dtype, minval=-lim2, maxval=lim2)
    b2 = jax.random.uniform(k4, (2,), dtype, minval=-lim2, maxval=lim2)
    return w1, b1, w2, b2


if __name__ == "__main__":
    key = jax.random.PRNGKey(0)
    kp, ky, ky2 = jax.random.split(key, 3)
    w1, b1, w2, b2 = init_params(kp)
    packed = pack_params(w1, b1, w2, b2)
    t = jnp.float32(0.0)  # unused, kept for signature parity with forward(t, y)

    # 1) Single forward evaluation (matches the PyTorch module's forward).
    B = 8
    y = jax.random.normal(ky, (B, 2), jnp.float32)
    out = jax.block_until_ready(odefunc_forward(t, y, packed))
    ref = jnp.tanh(y @ w1 + b1) @ w2 + b2
    assert out.shape == (B, 2)
    assert jnp.allclose(out, ref, atol=1e-5, rtol=1e-5)

    # 1b) Multi-tile + padded path (exercises grid>1 and batch padding).
    B2 = 300
    y2 = jax.random.normal(ky2, (B2, 2), jnp.float32)
    out2 = jax.block_until_ready(odefunc_forward(t, y2, packed))
    ref2 = jnp.tanh(y2 @ w1 + b1) @ w2 + b2
    assert out2.shape == (B2, 2)
    assert jnp.allclose(out2, ref2, atol=1e-5, rtol=1e-5)

    # 2) Fused multi-step Euler solve (many forward evals in one pallas_call).
    num_steps, dt = 16, 0.01
    y_final = jax.block_until_ready(
        odefunc_integrate_euler(y, packed, num_steps=num_steps, dt=dt))
    y_ref = y
    for _ in range(num_steps):
        y_ref = y_ref + dt * (jnp.tanh(y_ref @ w1 + b1) @ w2 + b2)
    assert y_final.shape == (B, 2)
    assert jnp.allclose(y_final, y_ref, atol=1e-4, rtol=1e-4)

    print("KERNEL_OK")
</pallas_src>

<mosaic_0001>
module attributes {stable_mosaic.version = 11 : i64} {
  func.func @odefunc_kernel(%arg0: i32, %arg1: memref<2x128xf32, #tpu.memory_space<vmem>>, %arg2: memref<24x128xf32, #tpu.memory_space<vmem>>, %arg3: memref<2x128xf32, #tpu.memory_space<vmem>>) attributes {dimension_semantics = [#tpu.dimension_semantics<parallel>], iteration_bounds = array<i64: 1>, scalar_prefetch = 0 : i64, scratch_operands = 0 : i64, tpu.core_type = #tpu.core_type<tc>, window_params = [{transform_indices = @transform_0, window_bounds = array<i64: 2, 128>}, {pipeline_mode = #tpu.pipeline_mode<synchronous>, transform_indices = @transform_1, window_bounds = array<i64: 24, 128>}, {transform_indices = @transform_2, window_bounds = array<i64: 2, 128>}]} {
    %c0 = arith.constant 0 : index
    %c0_0 = arith.constant 0 : index
    %0 = vector.load %arg2[%c0, %c0_0] : memref<24x128xf32, #tpu.memory_space<vmem>>, vector<24x128xf32>
    %1 = vector.extract_strided_slice %0 {offsets = [0, 0], sizes = [20, 1], strides = [1, 1]} : vector<24x128xf32> to vector<20x1xf32>
    %2 = vector.shape_cast %1 : vector<20x1xf32> to vector<20x1xf32>
    %3 = vector.broadcast %2 : vector<20x1xf32> to vector<20x128xf32>
    %4 = vector.extract_strided_slice %0 {offsets = [0, 1], sizes = [20, 1], strides = [1, 1]} : vector<24x128xf32> to vector<20x1xf32>
    %5 = vector.shape_cast %4 : vector<20x1xf32> to vector<20x1xf32>
    %6 = vector.broadcast %5 : vector<20x1xf32> to vector<20x128xf32>
    %7 = vector.extract_strided_slice %0 {offsets = [0, 2], sizes = [20, 1], strides = [1, 1]} : vector<24x128xf32> to vector<20x1xf32>
    %8 = vector.shape_cast %7 : vector<20x1xf32> to vector<20x1xf32>
    %9 = vector.broadcast %8 : vector<20x1xf32> to vector<20x128xf32>
    %10 = vector.extract_strided_slice %0 {offsets = [0, 3], sizes = [20, 1], strides = [1, 1]} : vector<24x128xf32> to vector<20x1xf32>
    %11 = vector.shape_cast %10 : vector<20x1xf32> to vector<20x1xf32>
    %12 = vector.broadcast %11 : vector<20x1xf32> to vector<20x128xf32>
    %cst = arith.constant 1.000000e+00 : f32
    %13 = vector.broadcast %cst : f32 to vector<20x128xf32>
    %14 = arith.mulf %12, %13 : vector<20x128xf32>
    %15 = vector.extract_strided_slice %0 {offsets = [0, 4], sizes = [20, 1], strides = [1, 1]} : vector<24x128xf32> to vector<20x1xf32>
    %16 = vector.shape_cast %15 : vector<20x1xf32> to vector<20x1xf32>
    %17 = vector.broadcast %16 : vector<20x1xf32> to vector<20x128xf32>
    %cst_1 = arith.constant 1.000000e+00 : f32
    %18 = vector.broadcast %cst_1 : f32 to vector<20x128xf32>
    %19 = arith.mulf %17, %18 : vector<20x128xf32>
    %20 = vector.extract_strided_slice %0 {offsets = [0, 5], sizes = [1, 1], strides = [1, 1]} : vector<24x128xf32> to vector<1x1xf32>
    %21 = vector.shape_cast %20 : vector<1x1xf32> to vector<1x1xf32>
    %22 = vector.broadcast %21 : vector<1x1xf32> to vector<1x128xf32>
    %cst_2 = arith.constant 1.000000e+00 : f32
    %23 = vector.broadcast %cst_2 : f32 to vector<1x128xf32>
    %24 = arith.mulf %22, %23 : vector<1x128xf32>
    %25 = vector.extract_strided_slice %0 {offsets = [1, 5], sizes = [1, 1], strides = [1, 1]} : vector<24x128xf32> to vector<1x1xf32>
    %26 = vector.shape_cast %25 : vector<1x1xf32> to vector<1x1xf32>
    %27 = vector.broadcast %26 : vector<1x1xf32> to vector<1x128xf32>
    %cst_3 = arith.constant 1.000000e+00 : f32
    %28 = vector.broadcast %cst_3 : f32 to vector<1x128xf32>
    %29 = arith.mulf %27, %28 : vector<1x128xf32>
    %c0_4 = arith.constant 0 : index
    %c0_5 = arith.constant 0 : index
    %30 = vector.load %arg1[%c0_4, %c0_5] : memref<2x128xf32, #tpu.memory_space<vmem>>, vector<1x128xf32>
    %c1 = arith.constant 1 : index
    %c0_6 = arith.constant 0 : index
    %31 = vector.load %arg1[%c1, %c0_6] : memref<2x128xf32, #tpu.memory_space<vmem>>, vector<1x128xf32>
    %32 = vector.shape_cast %30 : vector<1x128xf32> to vector<1x128xf32>
    %33 = vector.broadcast %32 : vector<1x128xf32> to vector<20x128xf32>
    %34 = arith.mulf %33, %3 : vector<20x128xf32>
    %35 = vector.shape_cast %31 : vector<1x128xf32> to vector<1x128xf32>
    %36 = vector.broadcast %35 : vector<1x128xf32> to vector<20x128xf32>
    %37 = arith.mulf %36, %6 : vector<20x128xf32>
    %38 = arith.addf %34, %37 : vector<20x128xf32>
    %39 = arith.addf %38, %9 : vector<20x128xf32>
    %40 = math.tanh %39 : vector<20x128xf32>
    %41 = arith.mulf %40, %14 : vector<20x128xf32>
    %cst_7 = arith.constant dense<0.000000e+00> : vector<128xf32>
    %42 = vector.multi_reduction <add>, %41, %cst_7 [0] : vector<20x128xf32> to vector<128xf32>
    %43 = vector.shape_cast %42 : vector<128xf32> to vector<1x128xf32>
    %44 = arith.addf %43, %24 : vector<1x128xf32>
    %45 = arith.mulf %40, %19 : vector<20x128xf32>
    %cst_8 = arith.constant dense<0.000000e+00> : vector<128xf32>
    %46 = vector.multi_reduction <add>, %45, %cst_8 [0] : vector<20x128xf32> to vector<128xf32>
    %47 = vector.shape_cast %46 : vector<128xf32> to vector<1x128xf32>
    %48 = arith.addf %47, %29 : vector<1x128xf32>
    %c0_9 = arith.constant 0 : index
    %c0_10 = arith.constant 0 : index
    %49 = vector.load %arg3[%c0_9, %c0_10] : memref<2x128xf32, #tpu.memory_space<vmem>>, vector<1x128xf32>
    tpu.vector_store %arg3[%c0_9, %c0_10], %44 {strides = array<i32>} : memref<2x128xf32, #tpu.memory_space<vmem>>, vector<1x128xf32>,
    %c1_11 = arith.constant 1 : index
    %c0_12 = arith.constant 0 : index
    %50 = vector.load %arg3[%c1_11, %c0_12] : memref<2x128xf32, #tpu.memory_space<vmem>>, vector<1x128xf32>
    tpu.vector_store %arg3[%c1_11, %c0_12], %48 {strides = array<i32>} : memref<2x128xf32, #tpu.memory_space<vmem>>, vector<1x128xf32>,
    return
  }
  func.func @transform_0(%arg0: i32) -> (i32, i32) {
    %c0_i32 = arith.constant 0 : i32
    %c0_i32_0 = arith.constant 0 : i32
    return %c0_i32, %arg0 : i32, i32
  }
  func.func @transform_1(%arg0: i32) -> (i32, i32) {
    %c0_i32 = arith.constant 0 : i32
    %c0_i32_0 = arith.constant 0 : i32
    %c0_i32_1 = arith.constant 0 : i32
    return %c0_i32, %c0_i32_0 : i32, i32
  }
  func.func @transform_2(%arg0: i32) -> (i32, i32) {
    %c0_i32 = arith.constant 0 : i32
    %c0_i32_0 = arith.constant 0 : i32
    return %c0_i32, %arg0 : i32, i32
  }
}

</mosaic_0001>

<bundles_post_ra>
// kernel: tpu_custom_call.1
= control target key start
LH: loop header
LB: loop body
LE: loop exit
PB: predicated region body
PF: predicated region fallthrough
CT: control target
= control target key end

     0   :  { %7 = vsyncpa [#allocation3], 0  ;;  %s325_s0 = inlined_call_operand.hbm [shape: f32[2,128], index: 0, kind: input, shape index: {}]   ;;  %s326_s1 = inlined_call_operand.hbm [shape: f32[24,128], index: 1, kind: input, shape index: {}]   ;;  %s327_s2 = inlined_call_operand.hbm [shape: f32[2,128], index: 2, kind: output, shape index: {}]  }
   0x1   :  { %8 = vsyncpa [#allocation6], 0 }
   0x2   :  { %9 = vsyncpa [#allocation4], 0  ;;  %s15_s11 = sshll.u32 %s325_s0, 4  ;;  %s288_s12 = smov [#allocation2]   ;;  %s16_s11 = int_to_ptr.hbm [resolvable:$true] %s15_s11 }
   0x3   :  { %s17_s13 = sshll.u32 %s288_s12, 4  ;;  %s25_s16 = sshll.u32 %s326_s1, 4  ;;  %s18_s13 = int_to_ptr.vmem [resolvable:$true] %s17_s13  ;;  %s26_s16 = int_to_ptr.hbm [resolvable:$true] %s25_s16 }
   0x4   :  { %20 = dma.hbm_to_vmem [thread:$0]  %s16_s11, 32, %s18_s13, [#allocation3]  }
   0x5   :  { %s289_s17 = smov [#allocation5]   ;;  %s290_s19 = smov 128  }
   0x6   :  { %s27_s18 = sshll.u32 %s289_s17, 4  ;;  %s291_s20 = smov 8   ;;  %s28_s18 = int_to_ptr.vmem [resolvable:$true] %s27_s18 }
   0x7   :  { %33 = dma.hbm_to_vmem [thread:$0]  %s26_s16, 384, %s28_s18, [#allocation6], %s290_s19, %s290_s19, %s291_s20  }
   0x8   :  { %282 = dma.done.wait [#allocation3], 32  }
   0x9   :  { %283 = vsyncadd [#allocation3], 4294967264 }
   0xa   :  { %284 = dma.done.wait [#allocation6], 384  }
   0xb   :  { %285 = vsyncadd [#allocation6], 4294966912  ;;  %v292_v0 = vmov 0   ;;  %v293_v1 = vmov 1   ;;  %v44_v2 = vld [vmem:[#allocation5 + $0x10] sm:$0xff]  ;;  %v42_v3 = vld [vmem:[#allocation5] sm:$0xff] }
   0xc   :  { %190 = vset.pattern.permute.xlu1 %v292_v0  ;;  %189 = vset.pattern.permute.xlu0 %v292_v0  ;;  %v43_v4 = vld [vmem:[#allocation5 + $0x8] sm:$0xff]  ;;  %v294_v5 = vmov 2   ;;  %v295_v6 = vmov 4   ;;  %v296_v7 = vmov 3   ;;  %v297_v8 = vmov 5   ;;  %s298_s0 = smov [#allocation7]  }
   0xd   :  { %192 = vset.pattern.permute.xlu2 %v293_v1  ;;  %57 = vperm.xlu1 %190, %v44_v2   ;;  %v202_v13 = vld [vmem:[#allocation2 + $0x1] ss:$0 sm:$0xff]  ;;  %v203_v14 = vld [vmem:[#allocation2] ss:$0 sm:$0xff]  ;;  %vm135_vm0 = vcmask 1043456   ;;  %s165_s1 = sshll.u32 %s298_s0, 4  ;;  %s166_s1 = int_to_ptr.vmem [resolvable:$true] %s165_s1 }
   0xe   :  { %47 = vperm.xlu0 %189, %v42_v3   ;;  %65 = vperm.xlu2 %192, %v43_v4   ;;  %s167_s23 = sshll.u32 %s327_s2, 4  ;;  %s168_s23 = int_to_ptr.hbm [resolvable:$true] %s167_s23 }
  0x15   :  { %191 = vset.pattern.permute.xlu1 %v293_v1 }
  0x16   :  { %52 = vperm.xlu0 %189, %v43_v4   ;;  %61 = vperm.xlu1 %191, %v42_v3  }
  0x17   :  { %69 = vperm.xlu2 %192, %v44_v2  }
  0x1e   :  { %193 = vset.pattern.permute.xlu0 %v294_v5  ;;  %194 = vset.pattern.permute.xlu1 %v294_v5 }
  0x1f   :  { %73 = vperm.xlu0 %193, %v42_v3   ;;  %77 = vperm.xlu1 %194, %v43_v4  }
  0x20   :  { %195 = vset.pattern.permute.xlu2 %v294_v5 }
  0x21   :  { %81 = vperm.xlu2 %195, %v44_v2  }
  0x27   :  { %198 = vset.pattern.permute.xlu0 %v295_v6  ;;  %196 = vset.pattern.permute.xlu1 %v296_v7 }
  0x28   :  { %97 = vperm.xlu0 %198, %v42_v3   ;;  %85 = vperm.xlu1 %196, %v42_v3  }
  0x29   :  { %197 = vset.pattern.permute.xlu2 %v296_v7 }
  0x2a   :  { %89 = vperm.xlu2 %197, %v43_v4  }
  0x30   :  { %201 = vset.pattern.permute.xlu0 %v297_v8  ;;  %199 = vset.pattern.permute.xlu1 %v295_v6 }
  0x31   :  { %101 = vperm.xlu1 %199, %v43_v4  }
  0x32   :  { %93 = vperm.xlu2 %197, %v44_v2  }
  0x39   :  { %105 = vperm.xlu1 %199, %v44_v2  }
  0x3a   :  { %200 = vset.pattern.permute.xlu2 %v297_v8 }
  0x3b   :  { %109 = vperm.xlu2 %200, %v42_v3  }
  0x68   :  { %v66_v9 = vpop.permute.xlu2 %65 }
  0x69   :  { %v120_v23 = vmul.f32 %v202_v13, %v66_v9 }
  0x71   :  { %v70_v10 = vpop.permute.xlu2 %69 }
  0x72   :  { %v121_v16 = vmul.f32 %v202_v13, %v70_v10 }
  0x7b   :  { %v82_v15 = vpop.permute.xlu2 %81 }
  0x7f   :  { %v58_v11 = vpop.permute.xlu1 %57 }
  0x80   :  { %v48_v12 = vpop.permute.xlu0 %47  ;;  %v117_v17 = vmul.f32 %v203_v14, %v58_v11 }
  0x81   :  { %v115_v21 = vmul.f32 %v203_v14, %v48_v12 }
  0x82   :  { %v124_v20 = vadd.f32 %v121_v16, %v117_v17 }
  0x84   :  { %v127_v25 = vadd.f32 %v124_v20, %v82_v15  ;;  %v90_v26 = vpop.permute.xlu2 %89 }
  0x86   :  { %204 = vtanh.f32 %v127_v25 }
  0x88   :  { %v53_v18 = vpop.permute.xlu0 %52  ;;  %v62_v19 = vpop.permute.xlu1 %61 }
  0x89   :  { %v119_v22 = vmul.f32 %v202_v13, %v62_v19  ;;  %v116_v24 = vmul.f32 %v203_v14, %v53_v18 }
  0x8b   :  { %v122_v27 = vadd.f32 %v119_v22, %v115_v21  ;;  %v123_v29 = vadd.f32 %v120_v23, %v116_v24 }
  0x8c   :  { %v205_v33 = vpop.eup %204  ;;  %v94_v34 = vpop.permute.xlu2 %93 }
  0x8d   :  { %v133_v37 = vmul.f32 %v205_v33, %v94_v34 }
  0x8f   :  { %v136_v42 = vsel %vm135_vm0, %v133_v37, 0.0 }
  0x91   :  { %v74_v28 = vpop.permute.xlu0 %73  ;;  %v78_v31 = vpop.permute.xlu1 %77 }
  0x92   :  { %v125_v30 = vadd.f32 %v122_v27, %v74_v28  ;;  %v126_v32 = vadd.f32 %v123_v29, %v78_v31 }
  0x94   :  { %206 = vtanh.f32 %v125_v30 }
  0x95   :  { %208 = vtanh.f32 %v126_v32  ;;  %v110_v52 = vpop.permute.xlu2 %109 }
  0x9a   :  { %v207_v35 = vpop.eup %206  ;;  %v86_v38 = vpop.permute.xlu1 %85 }
  0x9b   :  { %v209_v36 = vpop.eup %208  ;;  %v131_v39 = vmul.f32 %v207_v35, %v86_v38  ;;  %v98_v49 = vpop.permute.xlu0 %97 }
  0x9c   :  { %v132_v40 = vmul.f32 %v209_v36, %v90_v26  ;;  %v145_v53 = vmul.f32 %v207_v35, %v98_v49 }
  0x9e   :  { %v134_v41 = vadd.f32 %v132_v40, %v131_v39 }
  0xa0   :  { %v137_v43 = vadd.f32 %v136_v42, %v134_v41 }
  0xa2   :  { %v138_v44 = vrot.slane %v137_v43, 4 }
  0xa3   :  { %v102_v45 = vpop.permute.xlu1 %101 }
  0xa4   :  { %v139_v46 = vadd.f32 %v138_v44, %v137_v43  ;;  %v146_v50 = vmul.f32 %v209_v36, %v102_v45 }
  0xa6   :  { %v140_v47 = vrot.slane %v139_v46, 2  ;;  %v148_v57 = vadd.f32 %v146_v50, %v145_v53 }
  0xa8   :  { %v141_v48 = vadd.f32 %v140_v47, %v139_v46 }
  0xaa   :  { %v142_v51 = vrot.slane %v141_v48, 1 }
  0xab   :  { %v106_v54 = vpop.permute.xlu1 %105 }
  0xac   :  { %v143_v55 = vadd.f32 %v142_v51, %v141_v48  ;;  %v147_v56 = vmul.f32 %v205_v33, %v106_v54 }
  0xae   :  { %v144_v58 = vadd.f32 %v143_v55, %v110_v52  ;;  %v149_v59 = vsel %vm135_vm0, %v147_v56, 0.0 }
  0xaf   :  { %v150_v60 = vadd.f32 %v149_v59, %v148_v57 }
  0xb0   :  { %158 = vst [vmem:[#allocation7] sm:$0x1] %v144_v58 }
  0xb1   :  { %v151_v61 = vrot.slane %v150_v60, 4 }
  0xb3   :  { %v152_v62 = vadd.f32 %v151_v61, %v150_v60 }
  0xb5   :  { %v153_v63 = vrot.slane %v152_v62, 2 }
  0xb7   :  { %v154_v0 = vadd.f32 %v153_v63, %v152_v62 }
  0xb9   :  { %v155_v1 = vrot.slane %v154_v0, 1 }
  0xbb   :  { %v156_v2 = vadd.f32 %v155_v1, %v154_v0 }
  0xbd   :  { %v157_v3 = vadd.f32 %v156_v2, %v110_v52 }
  0xbf   :  { %159 = vst [vmem:[#allocation7] sm:$0x2] %v157_v3 }
  0xc0   :  { %170 = dma.vmem_to_hbm [thread:$0]  %s166_s1, 32, %s168_s23, [#allocation4]  }
  0xc1   :  { %286 = dma.done.wait [#allocation4], 32  }
  0xc2   :  { %287 = vsyncadd [#allocation4], 4294967264 }
  0xc3   :  { %175 = vsyncpa [#allocation3], 1 }
  0xc4   :  { %176 = vsyncpa [#allocation6], 1 }
  0xc5   :  { %177 = vsyncpa [#allocation4], 1 }

</bundles_post_ra>
